<compile_context>
chip_gen: v7x
topology: tpu7x:2x2x1
jax: 0.10.0
libtpu: 0.0.40
codegen_flags: <defaults>
</compile_context>

<pallas_src>
import functools

import jax
import jax.numpy as jnp
from jax.experimental import pallas as pl
from jax.experimental.pallas import tpu as pltpu
from jax.scipy.linalg import block_diag


def vit_block_kernel(x_ref, gamma_ref, beta_ref,
                     wq_ref, wk_ref, wv_ref,
                     bq_ref, bk_ref, bv_ref,
                     o_ref, *, n_heads, d_head, eps, mxu_dtype, approx_recip):
    """One grid step processes a tile of Bt full sequences."""
    bt, n, d = x_ref.shape
    x = x_ref[...].astype(jnp.float32)                      # (Bt, N, D)
    x2 = x.reshape(bt * n, d)                               # (Bt*N, D)

    # --- LayerNorm over the last dim (f32 elementwise on the VPU/EUP) ---
    mean = jnp.mean(x2, axis=-1, keepdims=True)
    var = jnp.mean((x2 - mean) ** 2, axis=-1, keepdims=True)
    xn = (x2 - mean) * jax.lax.rsqrt(var + eps) * gamma_ref[...] + beta_ref[...]

    # --- Fused Q/K/V projections: one (Bt*N, D) @ (D, D) MXU matmul each.
    #     Block-diagonal weights reproduce the per-head Linear(d_head, d_head)
    #     semantics exactly; 1/sqrt(d_head) is already folded into Wq/bq. ---
    xm = xn.astype(mxu_dtype)
    q = jnp.dot(xm, wq_ref[...], preferred_element_type=jnp.float32) + bq_ref[...]
    k = jnp.dot(xm, wk_ref[...], preferred_element_type=jnp.float32) + bk_ref[...]
    v = jnp.dot(xm, wv_ref[...], preferred_element_type=jnp.float32) + bv_ref[...]
    q = q.reshape(bt, n, d)
    k = k.reshape(bt, n, d)
    v = v.reshape(bt, n, d)

    # --- Per-head attention, batched over the Bt sequences in each einsum.
    #     Static loop: n_heads is small & fixed (use lax.fori_loop for large H).
    for h in range(n_heads):
        hs = h * d_head
        q_h = q[:, :, hs:hs + d_head].astype(mxu_dtype)     # (Bt, N, dh)
        k_h = k[:, :, hs:hs + d_head].astype(mxu_dtype)
        v_h = v[:, :, hs:hs + d_head].astype(mxu_dtype)
        s = jnp.einsum("bqd,bkd->bqk", q_h, k_h,
                       preferred_element_type=jnp.float32)  # (Bt, N, N)
        s = s - jnp.max(s, axis=-1, keepdims=True)
        p = jnp.exp(s)
        inv = pl.reciprocal(jnp.sum(p, axis=-1, keepdims=True),
                            approx=approx_recip)            # (Bt, N, 1)
        o_h = jnp.einsum("bqk,bkd->bqd", p.astype(mxu_dtype), v_h,
                         preferred_element_type=jnp.float32) * inv
        # Residual add + direct static-slice store (no concatenate).
        o_ref[:, :, hs:hs + d_head] = (
            x[:, :, hs:hs + d_head] + o_h).astype(o_ref.dtype)


def vit_block(x, gamma, beta, wq, bq, wk, bk, wv, bv, *,
              n_heads, use_bf16_matmuls=False, block_b=None):
    B, N, D = x.shape
    d_head = D // n_heads
    scale = 1.0 / (d_head ** 0.5)
    mxu_dtype = jnp.bfloat16 if use_bf16_matmuls else jnp.float32

    # --- Host-side (free) weight prep ---
    # PyTorch Linear computes seq @ W.T + b with W of shape (out, in): transpose
    # each head's W here, assemble block-diagonal (D, D) matrices so all heads
    # share one matmul, and fold the 1/sqrt(d_head) softmax scale into Q.
    wq_bd = block_diag(*[wq[h].T * scale for h in range(n_heads)]).astype(mxu_dtype)
    wk_bd = block_diag(*[wk[h].T for h in range(n_heads)]).astype(mxu_dtype)
    wv_bd = block_diag(*[wv[h].T for h in range(n_heads)]).astype(mxu_dtype)
    bq_f = (bq.reshape(1, D) * scale).astype(jnp.float32)
    bk_f = bk.reshape(1, D).astype(jnp.float32)
    bv_f = bv.reshape(1, D).astype(jnp.float32)
    gamma2 = gamma.reshape(1, D).astype(jnp.float32)
    beta2 = beta.reshape(1, D).astype(jnp.float32)

    # --- Sequences per grid step: amortize per-step pipeline overhead while
    #     keeping the working set well inside VMEM (sized for v7x's 64 MiB). ---
    if block_b is None:
        per_seq_bytes = (N * D * 4) * 10 + (N * N * 4) * 2   # x/xn/q/k/v/out + scores
        block_b = max(1, min(B, (4 * 1024 * 1024) // max(per_seq_bytes, 1)))
        while B % block_b:
            block_b -= 1

    kernel = functools.partial(
        vit_block_kernel, n_heads=n_heads, d_head=d_head, eps=1e-5,
        mxu_dtype=mxu_dtype, approx_recip=use_bf16_matmuls)

    def const_spec(shape):
        return pl.BlockSpec(shape, lambda b, _r=len(shape): (0,) * _r)

    return pl.pallas_call(
        kernel,
        out_shape=jax.ShapeDtypeStruct((B, N, D), x.dtype),
        grid=(B // block_b,),
        in_specs=[
            pl.BlockSpec((block_b, N, D), lambda b: (b, 0, 0)),          # x
            const_spec((1, D)), const_spec((1, D)),                      # gamma, beta
            const_spec((D, D)), const_spec((D, D)), const_spec((D, D)),  # Wq, Wk, Wv
            const_spec((1, D)), const_spec((1, D)), const_spec((1, D)),  # bq, bk, bv
        ],
        out_specs=pl.BlockSpec((block_b, N, D), lambda b: (b, 0, 0)),
        compiler_params=pltpu.CompilerParams(
            dimension_semantics=("parallel",),
            vmem_limit_bytes=32 * 1024 * 1024),
    )(x, gamma2, beta2, wq_bd, wk_bd, wv_bd, bq_f, bk_f, bv_f)


def reference(x, gamma, beta, wq, bq, wk, bk, wv, bv, *, n_heads):
    """Pure-JAX reference mirroring the PyTorch forward."""
    B, N, D = x.shape
    dh = D // n_heads
    mean = jnp.mean(x, axis=-1, keepdims=True)
    var = jnp.mean((x - mean) ** 2, axis=-1, keepdims=True)
    xn = (x - mean) / jnp.sqrt(var + 1e-5) * gamma + beta
    outs = []
    for h in range(n_heads):
        seq = xn[..., h * dh:(h + 1) * dh]                    # (B, N, dh)
        q = jnp.einsum("bnd,ed->bne", seq, wq[h]) + bq[h]
        k = jnp.einsum("bnd,ed->bne", seq, wk[h]) + bk[h]
        v = jnp.einsum("bnd,ed->bne", seq, wv[h]) + bv[h]
        s = jnp.einsum("bqe,bke->bqk", q, k) / (dh ** 0.5)
        a = jax.nn.softmax(s, axis=-1)
        outs.append(jnp.einsum("bqk,bke->bqe", a, v))
    return x + jnp.concatenate(outs, axis=-1)


if __name__ == "__main__":
    B, N, D, H = 2, 8, 32, 2
    dh = D // H

    key = jax.random.PRNGKey(0)
    ks = jax.random.split(key, 8)
    x = jax.random.normal(ks[0], (B, N, D), dtype=jnp.float32)

    # Deterministic parameter init (PyTorch Linear shapes: W is (out, in)).
    gamma = jnp.ones((D,), jnp.float32)
    beta = jnp.zeros((D,), jnp.float32)
    wq = 0.1 * jax.random.normal(ks[1], (H, dh, dh), dtype=jnp.float32)
    bq = 0.1 * jax.random.normal(ks[2], (H, dh), dtype=jnp.float32)
    wk = 0.1 * jax.random.normal(ks[3], (H, dh, dh), dtype=jnp.float32)
    bk = 0.1 * jax.random.normal(ks[4], (H, dh), dtype=jnp.float32)
    wv = 0.1 * jax.random.normal(ks[5], (H, dh, dh), dtype=jnp.float32)
    bv = 0.1 * jax.random.normal(ks[6], (H, dh), dtype=jnp.float32)

    ref = reference(x, gamma, beta, wq, bq, wk, bk, wv, bv, n_heads=H)

    # f32-operand path: tight numerical check.
    out = vit_block(x, gamma, beta, wq, bq, wk, bk, wv, bv, n_heads=H)
    out = jax.block_until_ready(out)
    assert out.shape == (B, N, D)
    assert jnp.allclose(out, ref, atol=1e-5, rtol=1e-5), (
        f"f32 max abs err {jnp.max(jnp.abs(out - ref))}")

    # bf16 MXU-operand path (recommended on v6e/v7x): looser check.
    out_bf16 = vit_block(x, gamma, beta, wq, bq, wk, bk, wv, bv,
                         n_heads=H, use_bf16_matmuls=True)
    out_bf16 = jax.block_until_ready(out_bf16)
    assert jnp.allclose(out_bf16, ref, atol=5e-2, rtol=5e-2), (
        f"bf16 max abs err {jnp.max(jnp.abs(out_bf16 - ref))}")

    print("KERNEL_OK")
</pallas_src>

<mosaic_0001>
module attributes {stable_mosaic.version = 11 : i64} {
  func.func @vit_block_kernel(%arg0: i32, %arg1: memref<2x8x32xf32, #tpu.memory_space<vmem>>, %arg2: memref<1x32xf32, #tpu.memory_space<vmem>>, %arg3: memref<1x32xf32, #tpu.memory_space<vmem>>, %arg4: memref<32x32xf32, #tpu.memory_space<vmem>>, %arg5: memref<32x32xf32, #tpu.memory_space<vmem>>, %arg6: memref<32x32xf32, #tpu.memory_space<vmem>>, %arg7: memref<1x32xf32, #tpu.memory_space<vmem>>, %arg8: memref<1x32xf32, #tpu.memory_space<vmem>>, %arg9: memref<1x32xf32, #tpu.memory_space<vmem>>, %arg10: memref<2x8x32xf32, #tpu.memory_space<vmem>>) attributes {dimension_semantics = [#tpu.dimension_semantics<parallel>], iteration_bounds = array<i64: 1>, scalar_prefetch = 0 : i64, scratch_operands = 0 : i64, tpu.core_type = #tpu.core_type<tc>, window_params = [{transform_indices = @transform_0, window_bounds = array<i64: 2, 8, 32>}, {pipeline_mode = #tpu.pipeline_mode<synchronous>, transform_indices = @transform_1, window_bounds = array<i64: 1, 32>}, {pipeline_mode = #tpu.pipeline_mode<synchronous>, transform_indices = @transform_2, window_bounds = array<i64: 1, 32>}, {pipeline_mode = #tpu.pipeline_mode<synchronous>, transform_indices = @transform_3, window_bounds = array<i64: 32, 32>}, {pipeline_mode = #tpu.pipeline_mode<synchronous>, transform_indices = @transform_4, window_bounds = array<i64: 32, 32>}, {pipeline_mode = #tpu.pipeline_mode<synchronous>, transform_indices = @transform_5, window_bounds = array<i64: 32, 32>}, {pipeline_mode = #tpu.pipeline_mode<synchronous>, transform_indices = @transform_6, window_bounds = array<i64: 1, 32>}, {pipeline_mode = #tpu.pipeline_mode<synchronous>, transform_indices = @transform_7, window_bounds = array<i64: 1, 32>}, {pipeline_mode = #tpu.pipeline_mode<synchronous>, transform_indices = @transform_8, window_bounds = array<i64: 1, 32>}, {transform_indices = @transform_9, window_bounds = array<i64: 2, 8, 32>}]} {
    %c0 = arith.constant 0 : index
    %c0_0 = arith.constant 0 : index
    %c0_1 = arith.constant 0 : index
    %0 = vector.load %arg1[%c0, %c0_0, %c0_1] : memref<2x8x32xf32, #tpu.memory_space<vmem>>, vector<2x8x32xf32>
    %1 = vector.shape_cast %0 : vector<2x8x32xf32> to vector<16x32xf32>
    %cst = arith.constant dense<0.000000e+00> : vector<16xf32>
    %2 = vector.multi_reduction <add>, %1, %cst [1] : vector<16x32xf32> to vector<16xf32>
    %3 = vector.shape_cast %2 : vector<16xf32> to vector<16x1xf32>
    %cst_2 = arith.constant 3.200000e+01 : f32
    %4 = vector.broadcast %cst_2 : f32 to vector<16x1xf32>
    %5 = arith.divf %3, %4 : vector<16x1xf32>
    %6 = vector.broadcast %5 : vector<16x1xf32> to vector<16x32xf32>
    %7 = arith.subf %1, %6 : vector<16x32xf32>
    %8 = arith.mulf %7, %7 : vector<16x32xf32>
    %cst_3 = arith.constant dense<0.000000e+00> : vector<16xf32>
    %9 = vector.multi_reduction <add>, %8, %cst_3 [1] : vector<16x32xf32> to vector<16xf32>
    %10 = vector.shape_cast %9 : vector<16xf32> to vector<16x1xf32>
    %cst_4 = arith.constant 3.200000e+01 : f32
    %11 = vector.broadcast %cst_4 : f32 to vector<16x1xf32>
    %12 = arith.divf %10, %11 : vector<16x1xf32>
    %13 = vector.broadcast %5 : vector<16x1xf32> to vector<16x32xf32>
    %14 = arith.subf %1, %13 : vector<16x32xf32>
    %cst_5 = arith.constant 9.99999974E-6 : f32
    %15 = vector.broadcast %cst_5 : f32 to vector<16x1xf32>
    %16 = arith.addf %12, %15 : vector<16x1xf32>
    %17 = math.rsqrt %16 : vector<16x1xf32>
    %18 = vector.broadcast %17 : vector<16x1xf32> to vector<16x32xf32>
    %19 = arith.mulf %14, %18 : vector<16x32xf32>
    %c0_6 = arith.constant 0 : index
    %c0_7 = arith.constant 0 : index
    %20 = vector.load %arg2[%c0_6, %c0_7] : memref<1x32xf32, #tpu.memory_space<vmem>>, vector<1x32xf32>
    %21 = vector.broadcast %20 : vector<1x32xf32> to vector<16x32xf32>
    %22 = arith.mulf %19, %21 : vector<16x32xf32>
    %c0_8 = arith.constant 0 : index
    %c0_9 = arith.constant 0 : index
    %23 = vector.load %arg3[%c0_8, %c0_9] : memref<1x32xf32, #tpu.memory_space<vmem>>, vector<1x32xf32>
    %24 = vector.broadcast %23 : vector<1x32xf32> to vector<16x32xf32>
    %25 = arith.addf %22, %24 : vector<16x32xf32>
    %c0_10 = arith.constant 0 : index
    %c0_11 = arith.constant 0 : index
    %26 = vector.load %arg4[%c0_10, %c0_11] : memref<32x32xf32, #tpu.memory_space<vmem>>, vector<32x32xf32>
    %cst_12 = arith.constant dense<0.000000e+00> : vector<16x32xf32>
    %27 = tpu.matmul %25, %26, %cst_12 {dimension_numbers = #tpu.dot_dimension_numbers<[1], [0], [0], [1], [0, 0, 1, 1], [], []>} : vector<16x32xf32>, vector<32x32xf32>, vector<16x32xf32> -> vector<16x32xf32>
    %c0_13 = arith.constant 0 : index
    %c0_14 = arith.constant 0 : index
    %28 = vector.load %arg7[%c0_13, %c0_14] : memref<1x32xf32, #tpu.memory_space<vmem>>, vector<1x32xf32>
    %29 = vector.broadcast %28 : vector<1x32xf32> to vector<16x32xf32>
    %30 = arith.addf %27, %29 : vector<16x32xf32>
    %c0_15 = arith.constant 0 : index
    %c0_16 = arith.constant 0 : index
    %31 = vector.load %arg5[%c0_15, %c0_16] : memref<32x32xf32, #tpu.memory_space<vmem>>, vector<32x32xf32>
    %cst_17 = arith.constant dense<0.000000e+00> : vector<16x32xf32>
    %32 = tpu.matmul %25, %31, %cst_17 {dimension_numbers = #tpu.dot_dimension_numbers<[1], [0], [0], [1], [0, 0, 1, 1], [], []>} : vector<16x32xf32>, vector<32x32xf32>, vector<16x32xf32> -> vector<16x32xf32>
    %c0_18 = arith.constant 0 : index
    %c0_19 = arith.constant 0 : index
    %33 = vector.load %arg8[%c0_18, %c0_19] : memref<1x32xf32, #tpu.memory_space<vmem>>, vector<1x32xf32>
    %34 = vector.broadcast %33 : vector<1x32xf32> to vector<16x32xf32>
    %35 = arith.addf %32, %34 : vector<16x32xf32>
    %c0_20 = arith.constant 0 : index
    %c0_21 = arith.constant 0 : index
    %36 = vector.load %arg6[%c0_20, %c0_21] : memref<32x32xf32, #tpu.memory_space<vmem>>, vector<32x32xf32>
    %cst_22 = arith.constant dense<0.000000e+00> : vector<16x32xf32>
    %37 = tpu.matmul %25, %36, %cst_22 {dimension_numbers = #tpu.dot_dimension_numbers<[1], [0], [0], [1], [0, 0, 1, 1], [], []>} : vector<16x32xf32>, vector<32x32xf32>, vector<16x32xf32> -> vector<16x32xf32>
    %c0_23 = arith.constant 0 : index
    %c0_24 = arith.constant 0 : index
    %38 = vector.load %arg9[%c0_23, %c0_24] : memref<1x32xf32, #tpu.memory_space<vmem>>, vector<1x32xf32>
    %39 = vector.broadcast %38 : vector<1x32xf32> to vector<16x32xf32>
    %40 = arith.addf %37, %39 : vector<16x32xf32>
    %41 = vector.shape_cast %30 : vector<16x32xf32> to vector<2x8x32xf32>
    %42 = vector.shape_cast %35 : vector<16x32xf32> to vector<2x8x32xf32>
    %43 = vector.shape_cast %40 : vector<16x32xf32> to vector<2x8x32xf32>
    %44 = vector.extract_strided_slice %41 {offsets = [0, 0, 0], sizes = [2, 8, 16], strides = [1, 1, 1]} : vector<2x8x32xf32> to vector<2x8x16xf32>
    %45 = vector.extract_strided_slice %42 {offsets = [0, 0, 0], sizes = [2, 8, 16], strides = [1, 1, 1]} : vector<2x8x32xf32> to vector<2x8x16xf32>
    %46 = vector.extract_strided_slice %43 {offsets = [0, 0, 0], sizes = [2, 8, 16], strides = [1, 1, 1]} : vector<2x8x32xf32> to vector<2x8x16xf32>
    "tpu.trace_start"() <{level = 10 : i32, message = "bqd,bkd->bqk"}> : () -> ()
    %cst_25 = arith.constant dense<0.000000e+00> : vector<2x8x8xf32>
    %47 = tpu.matmul %44, %45, %cst_25 {dimension_numbers = #tpu.dot_dimension_numbers<[2], [2], [1], [1], [0, 0, 0, 1, 1, 1], [0], [0]>} : vector<2x8x16xf32>, vector<2x8x16xf32>, vector<2x8x8xf32> -> vector<2x8x8xf32>
    "tpu.trace_stop"() : () -> ()
    %cst_26 = arith.constant dense<0xFF800000> : vector<2x8xf32>
    %48 = vector.multi_reduction <maximumf>, %47, %cst_26 [2] : vector<2x8x8xf32> to vector<2x8xf32>
    %49 = vector.shape_cast %48 : vector<2x8xf32> to vector<2x8x1xf32>
    %50 = vector.broadcast %49 : vector<2x8x1xf32> to vector<2x8x8xf32>
    %51 = arith.subf %47, %50 : vector<2x8x8xf32>
    %52 = math.exp %51 : vector<2x8x8xf32>
    %cst_27 = arith.constant dense<0.000000e+00> : vector<2x8xf32>
    %53 = vector.multi_reduction <add>, %52, %cst_27 [2] : vector<2x8x8xf32> to vector<2x8xf32>
    %54 = vector.shape_cast %53 : vector<2x8xf32> to vector<2x8x1xf32>
    %55 = tpu.reciprocal %54 : vector<2x8x1xf32> -> vector<2x8x1xf32>
    "tpu.trace_start"() <{level = 10 : i32, message = "bqk,bkd->bqd"}> : () -> ()
    %cst_28 = arith.constant dense<0.000000e+00> : vector<2x8x16xf32>
    %56 = tpu.matmul %52, %46, %cst_28 {dimension_numbers = #tpu.dot_dimension_numbers<[2], [1], [1], [2], [0, 0, 0, 1, 1, 2], [0], [0]>} : vector<2x8x8xf32>, vector<2x8x16xf32>, vector<2x8x16xf32> -> vector<2x8x16xf32>
    "tpu.trace_stop"() : () -> ()
    %57 = vector.broadcast %55 : vector<2x8x1xf32> to vector<2x8x16xf32>
    %58 = arith.mulf %56, %57 : vector<2x8x16xf32>
    %59 = vector.extract_strided_slice %0 {offsets = [0, 0, 0], sizes = [2, 8, 16], strides = [1, 1, 1]} : vector<2x8x32xf32> to vector<2x8x16xf32>
    %60 = arith.addf %59, %58 : vector<2x8x16xf32>
    %c0_29 = arith.constant 0 : index
    %c0_30 = arith.constant 0 : index
    %c0_31 = arith.constant 0 : index
    %61 = vector.load %arg10[%c0_29, %c0_30, %c0_31] : memref<2x8x32xf32, #tpu.memory_space<vmem>>, vector<2x8x16xf32>
    tpu.vector_store %arg10[%c0_29, %c0_30, %c0_31], %60 {strides = array<i32>} : memref<2x8x32xf32, #tpu.memory_space<vmem>>, vector<2x8x16xf32>,
    %62 = vector.extract_strided_slice %41 {offsets = [0, 0, 16], sizes = [2, 8, 16], strides = [1, 1, 1]} : vector<2x8x32xf32> to vector<2x8x16xf32>
    %63 = vector.extract_strided_slice %42 {offsets = [0, 0, 16], sizes = [2, 8, 16], strides = [1, 1, 1]} : vector<2x8x32xf32> to vector<2x8x16xf32>
    %64 = vector.extract_strided_slice %43 {offsets = [0, 0, 16], sizes = [2, 8, 16], strides = [1, 1, 1]} : vector<2x8x32xf32> to vector<2x8x16xf32>
    "tpu.trace_start"() <{level = 10 : i32, message = "bqd,bkd->bqk"}> : () -> ()
    %cst_32 = arith.constant dense<0.000000e+00> : vector<2x8x8xf32>
    %65 = tpu.matmul %62, %63, %cst_32 {dimension_numbers = #tpu.dot_dimension_numbers<[2], [2], [1], [1], [0, 0, 0, 1, 1, 1], [0], [0]>} : vector<2x8x16xf32>, vector<2x8x16xf32>, vector<2x8x8xf32> -> vector<2x8x8xf32>
    "tpu.trace_stop"() : () -> ()
    %cst_33 = arith.constant dense<0xFF800000> : vector<2x8xf32>
    %66 = vector.multi_reduction <maximumf>, %65, %cst_33 [2] : vector<2x8x8xf32> to vector<2x8xf32>
    %67 = vector.shape_cast %66 : vector<2x8xf32> to vector<2x8x1xf32>
    %68 = vector.broadcast %67 : vector<2x8x1xf32> to vector<2x8x8xf32>
    %69 = arith.subf %65, %68 : vector<2x8x8xf32>
    %70 = math.exp %69 : vector<2x8x8xf32>
    %cst_34 = arith.constant dense<0.000000e+00> : vector<2x8xf32>
    %71 = vector.multi_reduction <add>, %70, %cst_34 [2] : vector<2x8x8xf32> to vector<2x8xf32>
    %72 = vector.shape_cast %71 : vector<2x8xf32> to vector<2x8x1xf32>
    %73 = tpu.reciprocal %72 : vector<2x8x1xf32> -> vector<2x8x1xf32>
    "tpu.trace_start"() <{level = 10 : i32, message = "bqk,bkd->bqd"}> : () -> ()
    %cst_35 = arith.constant dense<0.000000e+00> : vector<2x8x16xf32>
    %74 = tpu.matmul %70, %64, %cst_35 {dimension_numbers = #tpu.dot_dimension_numbers<[2], [1], [1], [2], [0, 0, 0, 1, 1, 2], [0], [0]>} : vector<2x8x8xf32>, vector<2x8x16xf32>, vector<2x8x16xf32> -> vector<2x8x16xf32>
    "tpu.trace_stop"() : () -> ()
    %75 = vector.broadcast %73 : vector<2x8x1xf32> to vector<2x8x16xf32>
    %76 = arith.mulf %74, %75 : vector<2x8x16xf32>
    %77 = vector.extract_strided_slice %0 {offsets = [0, 0, 16], sizes = [2, 8, 16], strides = [1, 1, 1]} : vector<2x8x32xf32> to vector<2x8x16xf32>
    %78 = arith.addf %77, %76 : vector<2x8x16xf32>
    %c0_36 = arith.constant 0 : index
    %c0_37 = arith.constant 0 : index
    %c16 = arith.constant 16 : index
    %79 = vector.load %arg10[%c0_36, %c0_37, %c16] : memref<2x8x32xf32, #tpu.memory_space<vmem>>, vector<2x8x16xf32>
    tpu.vector_store %arg10[%c0_36, %c0_37, %c16], %78 {strides = array<i32>} : memref<2x8x32xf32, #tpu.memory_space<vmem>>, vector<2x8x16xf32>,
    return
  }
  func.func @transform_0(%arg0: i32) -> (i32, i32, i32) {
    %c0_i32 = arith.constant 0 : i32
    %c0_i32_0 = arith.constant 0 : i32
    %c0_i32_1 = arith.constant 0 : i32
    return %arg0, %c0_i32, %c0_i32_0 : i32, i32, i32
  }
  func.func @transform_1(%arg0: i32) -> (i32, i32) {
    %c0_i32 = arith.constant 0 : i32
    %c0_i32_0 = arith.constant 0 : i32
    %c0_i32_1 = arith.constant 0 : i32
    return %c0_i32, %c0_i32_0 : i32, i32
  }
  func.func @transform_2(%arg0: i32) -> (i32, i32) {
    %c0_i32 = arith.constant 0 : i32
    %c0_i32_0 = arith.constant 0 : i32
    %c0_i32_1 = arith.constant 0 : i32
    return %c0_i32, %c0_i32_0 : i32, i32
  }
  func.func @transform_3(%arg0: i32) -> (i32, i32) {
    %c0_i32 = arith.constant 0 : i32
    %c0_i32_0 = arith.constant 0 : i32
    %c0_i32_1 = arith.constant 0 : i32
    return %c0_i32, %c0_i32_0 : i32, i32
  }
  func.func @transform_4(%arg0: i32) -> (i32, i32) {
    %c0_i32 = arith.constant 0 : i32
    %c0_i32_0 = arith.constant 0 : i32
    %c0_i32_1 = arith.constant 0 : i32
    return %c0_i32, %c0_i32_0 : i32, i32
  }
  func.func @transform_5(%arg0: i32) -> (i32, i32) {
    %c0_i32 = arith.constant 0 : i32
    %c0_i32_0 = arith.constant 0 : i32
    %c0_i32_1 = arith.constant 0 : i32
    return %c0_i32, %c0_i32_0 : i32, i32
  }
  func.func @transform_6(%arg0: i32) -> (i32, i32) {
    %c0_i32 = arith.constant 0 : i32
    %c0_i32_0 = arith.constant 0 : i32
    %c0_i32_1 = arith.constant 0 : i32
    return %c0_i32, %c0_i32_0 : i32, i32
  }
  func.func @transform_7(%arg0: i32) -> (i32, i32) {
    %c0_i32 = arith.constant 0 : i32
    %c0_i32_0 = arith.constant 0 : i32
    %c0_i32_1 = arith.constant 0 : i32
    return %c0_i32, %c0_i32_0 : i32, i32
  }
  func.func @transform_8(%arg0: i32) -> (i32, i32) {
    %c0_i32 = arith.constant 0 : i32
    %c0_i32_0 = arith.constant 0 : i32
    %c0_i32_1 = arith.constant 0 : i32
    return %c0_i32, %c0_i32_0 : i32, i32
  }
  func.func @transform_9(%arg0: i32) -> (i32, i32, i32) {
    %c0_i32 = arith.constant 0 : i32
    %c0_i32_0 = arith.constant 0 : i32
    %c0_i32_1 = arith.constant 0 : i32
    return %arg0, %c0_i32, %c0_i32_0 : i32, i32, i32
  }
}

</mosaic_0001>

<bundles_post_ra>
// kernel: tpu_custom_call.1
= control target key start
LH: loop header
LB: loop body
LE: loop exit
PB: predicated region body
PF: predicated region fallthrough
CT: control target
= control target key end

     0   :  { %14 = vsyncpa [#allocation3], 0  ;;  %s1632_s0 = inlined_call_operand.hbm [shape: f32[2,8,32], index: 0, kind: input, shape index: {}]   ;;  %s1633_s1 = inlined_call_operand.vmem [shape: f32[1,32], index: 1, kind: input, shape index: {}]   ;;  %s1634_s2 = inlined_call_operand.vmem [shape: f32[1,32], index: 2, kind: input, shape index: {}]   ;;  %s1635_s3 = inlined_call_operand.hbm [shape: f32[32,32], index: 3, kind: input, shape index: {}]   ;;  %s1636_s4 = inlined_call_operand.hbm [shape: f32[32,32], index: 4, kind: input, shape index: {}]   ;;  %s1637_s5 = inlined_call_operand.hbm [shape: f32[32,32], index: 5, kind: input, shape index: {}]   ;;  %s1638_s6 = inlined_call_operand.vmem [shape: f32[1,32], index: 6, kind: input, shape index: {}]   ;;  %s1639_s7 = inlined_call_operand.vmem [shape: f32[1,32], index: 7, kind: input, shape index: {}]   ;;  %s1640_s8 = inlined_call_operand.vmem [shape: f32[1,32], index: 8, kind: input, shape index: {}]   ;;  %s1641_s9 = inlined_call_operand.hbm [shape: f32[2,8,32], index: 9, kind: output, shape index: {}]  }
   0x1   :  { %15 = vsyncpa [#allocation6], 0 }
   0x2   :  { %16 = vsyncpa [#allocation9], 0 }
   0x3   :  { %17 = vsyncpa [#allocation4], 0  ;;  %s1393_s30 = smov [#allocation5]   ;;  %s1394_s11 = smov [#allocation2]  }
   0x4   :  { %s39_s10 = sshll.u32 %s1393_s30, 4  ;;  %s23_s12 = sshll.u32 %s1394_s11, 4  ;;  %s40_s10 = int_to_ptr.vmem [resolvable:$true] %s39_s10  ;;  %s1454_s12 = int_to_ptr.vmem [resolvable:$true] %s23_s12 }
   0x5   :  { %s1275_s15 = scalar_lea.hbm %s1635_s3, 512 }
   0x6   :  { %p1276_p0 = scmp.ne.s32.totalorder %s1635_s3, %s1275_s15  ;;  %p1279_p1 = scmp.lt.u32.totalorder %s1275_s15, %s1635_s3 }
   0x8   :  { %p1281_p2 = pnand %p1279_p1, %p1276_p0 }
   0xa   :  { %1284 = shalt.err (!%p1281_p2)
}
   0xb   :  { %s1285_s20 = scalar_lea.vmem %s40_s10, 512  ;;  %p1290_p4 = scmp.lt.s32.totalorder %s40_s10, %s40_s10 }
   0xc   :  { %p1286_p3 = scmp.ne.s32.totalorder %s40_s10, %s1285_s20  ;;  %p1291_p5 = scmp.lt.s32.totalorder %s1285_s20, %s1285_s20 }
   0xe   :  { %p1292_p6 = por %p1291_p5, %p1290_p4 }
  0x10   :  { %p1293_p7 = pnand %p1292_p6, %p1286_p3 }
  0x12   :  { %1296 = shalt.err (!%p1293_p7)
}
  0x13   :  { %s1395_s21 = smov 128   ;;  %s1396_s22 = smov 8  }
  0x14   :  { %45 = dma.hbm_to_vmem [thread:$0]  %s1635_s3, 512, %s40_s10, [#allocation6], %s1395_s21, %s1395_s21, %s1396_s22  }
  0x15   :  { %s1297_s27 = scalar_lea.hbm %s1632_s0, 256 }
  0x16   :  { %p1298_p8 = scmp.ne.s32.totalorder %s1632_s0, %s1297_s27  ;;  %p1301_p9 = scmp.lt.u32.totalorder %s1297_s27, %s1632_s0 }
  0x18   :  { %p1303_p10 = pnand %p1301_p9, %p1298_p8 }
  0x1a   :  { %1306 = shalt.err (!%p1303_p10)
}
  0x1b   :  { %s1307_s13 = scalar_lea.vmem %s1454_s12, 256  ;;  %p1312_p12 = scmp.lt.s32.totalorder %s1454_s12, %s1454_s12 }
  0x1c   :  { %p1308_p11 = scmp.ne.s32.totalorder %s1454_s12, %s1307_s13  ;;  %p1313_p13 = scmp.lt.s32.totalorder %s1307_s13, %s1307_s13 }
  0x1e   :  { %p1314_p0 = por %p1313_p13, %p1312_p12 }
  0x20   :  { %p1315_p1 = pnand %p1314_p0, %p1308_p11 }
  0x22   :  { %1318 = shalt.err (!%p1315_p1)
}
  0x23   :  { %29 = dma.hbm_to_vmem [thread:$0]  %s1632_s0, 256, %s1454_s12, [#allocation3], %s1395_s21, %s1395_s21, %s1396_s22  }
  0x24   :  { %s1397_s14 = smov [#allocation7]   ;;  %s1398_s16 = smov [#allocation8]  }
  0x25   :  { %s51_s15 = sshll.u32 %s1397_s14, 4  ;;  %s63_s17 = sshll.u32 %s1398_s16, 4  ;;  %s52_s15 = int_to_ptr.vmem [resolvable:$true] %s51_s15  ;;  %s1491_s17 = int_to_ptr.vmem [resolvable:$true] %s63_s17 }
  0x26   :  { %s1319_s20 = scalar_lea.hbm %s1636_s4, 512 }
  0x27   :  { %p1320_p2 = scmp.ne.s32.totalorder %s1636_s4, %s1319_s20  ;;  %p1323_p3 = scmp.lt.u32.totalorder %s1319_s20, %s1636_s4 }
  0x29   :  { %p1325_p4 = pnand %p1323_p3, %p1320_p2 }
  0x2b   :  { %1328 = shalt.err (!%p1325_p4)
}
  0x2c   :  { %s1329_s0 = scalar_lea.vmem %s52_s15, 512  ;;  %p1334_p6 = scmp.lt.s32.totalorder %s52_s15, %s52_s15 }
  0x2d   :  { %p1330_p5 = scmp.ne.s32.totalorder %s52_s15, %s1329_s0  ;;  %p1335_p7 = scmp.lt.s32.totalorder %s1329_s0, %s1329_s0 }
  0x2f   :  { %p1336_p8 = por %p1335_p7, %p1334_p6 }
  0x31   :  { %p1337_p9 = pnand %p1336_p8, %p1330_p5 }
  0x33   :  { %1340 = shalt.err (!%p1337_p9)
}
  0x34   :  { %57 = dma.hbm_to_vmem [thread:$0]  %s1636_s4, 512, %s52_s15, [#allocation6], %s1395_s21, %s1395_s21, %s1396_s22  }
  0x35   :  { %s1341_s30 = scalar_lea.hbm %s1637_s5, 512 }
  0x36   :  { %p1342_p10 = scmp.ne.s32.totalorder %s1637_s5, %s1341_s30  ;;  %p1345_p11 = scmp.lt.u32.totalorder %s1341_s30, %s1637_s5 }
  0x38   :  { %p1347_p12 = pnand %p1345_p11, %p1342_p10 }
  0x3a   :  { %1350 = shalt.err (!%p1347_p12)
}
  0x3b   :  { %s1351_s14 = scalar_lea.vmem %s1491_s17, 512  ;;  %p1356_p0 = scmp.lt.s32.totalorder %s1491_s17, %s1491_s17 }
  0x3c   :  { %p1352_p13 = scmp.ne.s32.totalorder %s1491_s17, %s1351_s14  ;;  %p1357_p1 = scmp.lt.s32.totalorder %s1351_s14, %s1351_s14 }
  0x3e   :  { %p1358_p2 = por %p1357_p1, %p1356_p0 }
  0x40   :  { %p1359_p3 = pnand %p1358_p2, %p1352_p13 }
  0x42   :  { %1362 = shalt.err (!%p1359_p3)
}
  0x43   :  { %69 = dma.hbm_to_vmem [thread:$0]  %s1637_s5, 512, %s1491_s17, [#allocation9], %s1395_s21, %s1395_s21, %s1396_s22  }
  0x44   :  { %1385 = dma.done.wait [#allocation3], 256  }
  0x45   :  { %1386 = vsyncadd [#allocation3], 4294967040 }
  0x46   :  { %1387 = dma.done.wait [#allocation6], 1024  }
  0x47   :  { %1388 = vsyncadd [#allocation6], 4294966272 }
  0x48   :  { %1389 = dma.done.wait [#allocation9], 512  }
  0x49   :  { %1390 = vsyncadd [#allocation9], 4294966784  ;;  %vm90_vm0 = vcmask 261120   ;;  %v1528_v0 = vld [vmem:[#allocation2] sm:$0xff]  ;;  %v1530_v1 = vld [vmem:[#allocation2 + $0x8] sm:$0xff]  ;;  %v1399_v48 = vmov 0.0  }
  0x4a   :  { %v91_v2 = vsel %vm90_vm0, %v1528_v0, 0.0  ;;  %v94_v3 = vsel %vm90_vm0, %v1530_v1, 0.0  ;;  %v136_v14 = vld [vmem:[#allocation5] sm:$0xff]  ;;  %v137_v15 = vld [vmem:[#allocation5 + $0x8] sm:$0xff]  ;;  %v138_v19 = vld [vmem:[#allocation5 + $0x10] sm:$0xff]  ;;  %vm1400_vm1 = vmmov 0  }
  0x4b   :  { %92 = vadd.xlane.f32.xlu0 %v91_v2  ;;  %v228_v16 = vld [vmem:[#allocation7] sm:$0xff]  ;;  %v1220_v17 = vpack.c.bf16 %v137_v15, %v136_v14  ;;  %v229_v18 = vld [vmem:[#allocation7 + $0x8] sm:$0xff]  ;;  %v139_v20 = vld [vmem:[#allocation5 + $0x18] sm:$0xff]  ;;  %vm400_vm2 = vcmask 130048   ;;  %s1401_s23 = smov 112   ;;  %vm553_vm3 = vcmask 64512  }
  0x4c   :  { %v1228_v21 = vpack.c.bf16 %v229_v18, %v228_v16  ;;  %v1224_v22 = vpack.c.bf16 %v139_v20, %v138_v19  ;;  %v230_v23 = vld [vmem:[#allocation7 + $0x10] sm:$0xff]  ;;  %v231_v24 = vld [vmem:[#allocation7 + $0x18] sm:$0xff]  ;;  %v314_v26 = vld [vmem:[#allocation8] sm:$0xff]  ;;  %vm1068_vm4 = vcmask 261248  }
  0x4d   :  { %1221 = vmatprep.subr.bf16.mxu0 %v1220_v17  ;;  %v1232_v25 = vpack.c.bf16 %v231_v24, %v230_v23  ;;  %v315_v27 = vld [vmem:[#allocation8 + $0x8] sm:$0xff]  ;;  %v1090_v36 = vld [vmem:[%s1633_s1] ss:$0 sm:$0xff]  ;;  %v317_v44 = vld [vmem:[#allocation8 + $0x18] sm:$0xff] }
  0x4e   :  { %1223 = vmatpush3.bf16.msra.mxu0 %v1220_v17  ;;  %1229 = vmatprep.subr.bf16.mxu1 %v1228_v21  ;;  %v1236_v28 = vpack.c.bf16 %v315_v27, %v314_v26  ;;  %v1091_v38 = vld [vmem:[%s1634_s2] ss:$0 sm:$0xff] }
  0x4f   :  { %95 = vadd.xlane.f32.xlu0 %v94_v3  ;;  %1231 = vmatpush3.bf16.msra.mxu1 %v1228_v21  ;;  %v316_v43 = vld [vmem:[#allocation8 + $0x10] sm:$0xff] }
  0x50   :  { %1225 = vmatprep.subr.bf16.mxu0 %v1224_v22  ;;  %1233 = vmatprep.subr.bf16.mxu1 %v1232_v25  ;;  %v1240_v47 = vpack.c.bf16 %v317_v44, %v316_v43  ;;  %v1095_v49 = vld [vmem:[%s1639_s7] ss:$0 sm:$0xff] }
  0x51   :  { %v1092_v55 = vld [vmem:[%s1638_s6] ss:$0 sm:$0xff]  ;;  %s1402_s6 = smov 16  }
  0x52   :  { %1227 = vmatpush3.bf16.msra.mxu0 %v1224_v22  ;;  %v1098_v58 = vld [vmem:[%s1640_s8] ss:$0 sm:$0xff]  ;;  %s1403_s8 = smov [#allocation10]  }
  0x53   :  { %1235 = vmatpush3.bf16.msra.mxu1 %v1232_v25  ;;  %1237 = vmatprep.subr.bf16.mxu0 %v1236_v28  ;;  %s1076_s25 = sshll.u32 %s1403_s8, 4  ;;  %s1077_s25 = int_to_ptr.vmem [resolvable:$true] %s1076_s25 }
  0x54   :  { %1180 = vmatprep.subr.mxu1 %v1399_v48  ;;  %s1363_s26 = scalar_lea.vmem %s1077_s25, 256  ;;  %p1368_p5 = scmp.lt.s32.totalorder %s1077_s25, %s1077_s25 }
  0x55   :  { %p1364_p4 = scmp.ne.s32.totalorder %s1077_s25, %s1363_s26  ;;  %p1369_p6 = scmp.lt.s32.totalorder %s1363_s26, %s1363_s26 }
  0x57   :  { %p1370_p7 = por %p1369_p6, %p1368_p5 }
  0x59   :  { %p1371_p8 = pnand %p1370_p7, %p1364_p4 }
  0xd8   :  { %v93_v4 = vpop.xlane.xlu0 %92 }
  0xd9   :  { %v98_v5 = vmul.f32 0.03125, %v93_v4 }
  0xdb   :  { %v100_v6 = vsub.f32 %v1528_v0, %v98_v5 }
  0xdc   :  { %v96_v7 = vpop.xlane.xlu0 %95 }
  0xdd   :  { %v99_v8 = vmul.f32 0.03125, %v96_v7  ;;  %v102_v9 = vmul.f32 %v100_v6, %v100_v6 }
  0xdf   :  { %v101_v10 = vsub.f32 %v1530_v1, %v99_v8  ;;  %v104_v11 = vsel %vm90_vm0, %v102_v9, 0.0 }
  0xe0   :  { %105 = vadd.xlane.f32.xlu1 %v104_v11 }
  0xe1   :  { %v103_v12 = vmul.f32 %v101_v10, %v101_v10 }
  0xe3   :  { %v107_v13 = vsel %vm90_vm0, %v103_v12, 0.0 }
  0xe4   :  { %108 = vadd.xlane.f32.xlu1 %v107_v13 }
 0x16d   :  { %v106_v29 = vpop.xlane.xlu1 %105 }
 0x16e   :  { %v110_v30 = vmul.f32 0.03125, %v106_v29 }
 0x170   :  { %v112_v31 = vadd.f32 1e-05, %v110_v30 }
 0x171   :  { %v109_v32 = vpop.xlane.xlu1 %108 }
 0x172   :  { %1255 = vrsqrt.f32 %v112_v31  ;;  %v111_v33 = vmul.f32 0.03125, %v109_v32 }
 0x174   :  { %v113_v34 = vadd.f32 1e-05, %v111_v33 }
 0x176   :  { %1257 = vrsqrt.f32 %v113_v34 }
 0x17c   :  { %v1256_v35 = vpop.eup %1255 }
 0x17d   :  { %v116_v37 = vmul.f32 %v1256_v35, %v100_v6 }
 0x17f   :  { %v125_v39 = vmul.f32 %v1090_v36, %v116_v37 }
 0x180   :  { %v1258_v40 = vpop.eup %1257 }
 0x181   :  { %v117_v41 = vmul.f32 %v1258_v40, %v101_v10  ;;  %v134_v42 = vadd.f32 %v1091_v38, %v125_v39 }
 0x183   :  { %v126_v45 = vmul.f32 %v1090_v36, %v117_v41  ;;  %1155 = vmatprep.mubr.msk.f32.mxu0 %vm90_vm0, %v134_v42  ;;  %1166 = vmatprep.mubr.msk.f32.mxu1 %vm90_vm0, %v134_v42 }
 0x185   :  { %v135_v46 = vadd.f32 %v1091_v38, %v126_v45 }
 0x187   :  { %1156 = vmatmul.mubr.msk.f32.vlgmr.msra.gmra.mrb[0].mxu0 %vm90_vm0, %v135_v46  ;;  %1167 = vmatmul.mubr.msk.f32.vlgmr.msra.gmra.mrb[0].mxu1 %vm90_vm0, %v135_v46 }
 0x188   :  { %1239 = vmatpush3.bf16.msra.mxu0 %v1236_v28  ;;  %1177 = vmatprep.mubr.msk.f32.mxu0 %vm90_vm0, %v134_v42 }
 0x189   :  { %1241 = vmatprep.subr.bf16.mxu0 %v1240_v47  ;;  %1182 = vmatprep.mubr.msk.f32.mxu1 %vm1400_vm1, %v1399_v48 }
 0x18c   :  { %1243 = vmatpush3.bf16.msra.mxu0 %v1240_v47 }
 0x18d   :  { %1190 = vmatprep.subr.mxu0 %v1399_v48 }
 0x18f   :  { %1178 = vmatmul.mubr.msk.f32.vlgmr.msra.gmra.mrb[2].mxu0 %vm90_vm0, %v135_v46 }
 0x190   :  { %1192 = vmatprep.mubr.msk.f32.mxu0 %vm1400_vm1, %v1399_v48 }
 0x25a   :  { %v1157_v50 = vpop.f32.mrb[0].mxu0  ;;  %v1168_v51 = vpop.f32.mrb[0].mxu1 }
 0x25b   :  { %v311_v52 = vadd.f32 %v1168_v51, %v1095_v49  ;;  %v219_v53 = vpop.f32.mrb[1].mxu0  ;;  %v305_v54 = vpop.f32.mrb[1].mxu1  ;;  %v225_v60 = vadd.f32 %v1157_v50, %v1092_v55 }
 0x25c   :  { %v306_v56 = vadd.f32 %v1095_v49, %v305_v54  ;;  %v220_v57 = vadd.f32 %v1092_v55, %v219_v53 }
 0x25d   :  { %806 = vrot.lane.b32.xlu1 %v311_v52, %s1401_s23 }
 0x25e   :  { %1181 = vmatpush3.xpose.msk.msra.mxu1 %vm400_vm2, %v306_v56 }
 0x25f   :  { %1185 = vmatprep.subr.mxu1 %v1399_v48 }
 0x261   :  { %726 = vrot.lane.b32.xlu1 %v220_v57, %s1401_s23  ;;  %1183 = vmatmul.mubr.msk.f32.vlgmr.msra.gmra.mrb[2].mxu1 %vm400_vm2, %v220_v57 }
 0x262   :  { %v1179_v59 = vpop.f32.mrb[2].mxu0  ;;  %1186 = vmatpush3.xpose.msk.msra.mxu1 %vm400_vm2, %v311_v52  ;;  %1187 = vmatprep.mubr.msk.f32.mxu1 %vm1400_vm1, %v1399_v48 }
 0x263   :  { %v391_v61 = vpop.f32.mrb[3].mxu0  ;;  %1195 = vmatprep.subr.mxu1 %v1399_v48  ;;  %v397_v62 = vadd.f32 %v1179_v59, %v1098_v58 }
 0x264   :  { %v392_v63 = vadd.f32 %v1098_v58, %v391_v61 }
 0x265   :  { %1188 = vmatmul.mubr.msk.f32.vlgmr.msra.gmra.mrb[4].mxu1 %vm400_vm2, %v225_v60 }
 0x266   :  { %1191 = vmatpush3.msra.mxu0 %v392_v63  ;;  %1196 = vmatpush3.msra.mxu1 %v397_v62 }
 0x267   :  { %1200 = vmatprep.subr.mxu0 %v1399_v48  ;;  %1197 = vmatprep.mubr.msk.f32.mxu1 %vm1400_vm1, %v1399_v48 }
 0x268   :  { %1205 = vmatprep.subr.mxu1 %v1399_v48 }
 0x2cf   :  { %v807_v8 = vpop.permute.xlu1 %806 }
 0x2d3   :  { %v727_v9 = vpop.permute.xlu1 %726 }
 0x334   :  { %v473_v2 = vpop.f32.mrb[2].mxu1 }
 0x335   :  { %v1184_v3 = vpop.f32.mrb[3].mxu1  ;;  %v554_v4 = vsel %vm553_vm3, %v473_v2, -inf }
 0x336   :  { %555 = vmax.xlane.f32.xlu0 %v554_v4 }
 0x338   :  { %v549_v5 = vpop.f32.mrb[4].mxu1 }
 0x339   :  { %v1189_v6 = vpop.f32.mrb[5].mxu1  ;;  %v557_v7 = vsel %vm553_vm3, %v549_v5, -inf }
 0x33a   :  { %558 = vmax.xlane.f32.xlu1 %v557_v7 }
 0x34b   :  { %804 = vrot.lane.b32.xlu1 %v225_v60, %s1401_s23 }
 0x34c   :  { %728 = vrot.lane.b32.xlu0 %v306_v56, %s1401_s23 }
 0x3c3   :  { %v556_v10 = vpop.xlane.xlu0 %555 }
 0x3c4   :  { %v560_v11 = vsub.f32 %v473_v2, %v556_v10 }
 0x3c6   :  { %v562_v12 = vmul.f32 1.442695, %v560_v11 }
 0x3c7   :  { %v559_v13 = vpop.xlane.xlu1 %558  ;;  %v729_v17 = vpop.permute.xlu0 %728 }
 0x3c8   :  { %1259 = vpow2.f32 %v562_v12  ;;  %v561_v14 = vsub.f32 %v549_v5, %v559_v13 }
 0x3ca   :  { %v564_v15 = vmul.f32 1.442695, %v561_v14 }
 0x3cb   :  { %v805_v19 = vpop.permute.xlu1 %804 }
 0x3cc   :  { %1261 = vpow2.f32 %v564_v15 }
 0x3d2   :  { %v1260_v16 = vpop.eup %1259 }
 0x3d3   :  { %1193 = vmatmul.mubr.msk.f32.vlgmr.msra.gmra.mrb[4].mxu0 %vm553_vm3, %v1260_v16  ;;  %v566_v41 = vsel %vm553_vm3, %v1260_v16, 0.0 }
 0x3d4   :  { %1201 = vmatpush3.xpose.msk.msra.mxu0 %vm400_vm2, %v729_v17  ;;  %1202 = vmatprep.mubr.msk.f32.mxu0 %vm1400_vm1, %v1399_v48 }
 0x3d5   :  { %1210 = vmatprep.subr.mxu0 %v1399_v48 }
 0x3d6   :  { %v1262_v18 = vpop.eup %1261 }
 0x3d7   :  { %1198 = vmatmul.mubr.msk.f32.vlgmr.msra.gmra.mrb[6].mxu1 %vm553_vm3, %v1262_v18  ;;  %1203 = vmatmul.mubr.msk.f32.vlgmr.msra.gmra.mrb[6].mxu0 %vm400_vm2, %v727_v9  ;;  %v569_v43 = vsel %vm553_vm3, %v1262_v18, 0.0 }
 0x3d8   :  { %1206 = vmatpush3.xpose.msk.msra.mxu1 %vm400_vm2, %v807_v8  ;;  %1207 = vmatprep.mubr.msk.f32.mxu1 %vm1400_vm1, %v1399_v48 }
 0x3d9   :  { %1215 = vmatprep.subr.mxu1 %v1399_v48  ;;  %1212 = vmatprep.mubr.msk.f32.mxu0 %vm1400_vm1, %v1399_v48 }
 0x3db   :  { %1208 = vmatmul.mubr.msk.f32.vlgmr.msra.gmra.mrb[8].mxu1 %vm400_vm2, %v805_v19 }
 0x3dc   :  { %1217 = vmatprep.mubr.msk.f32.mxu1 %vm1400_vm1, %v1399_v48 }
 0x4a6   :  { %v643_v20 = vpop.f32.mrb[4].mxu0 }
 0x4a7   :  { %v1194_v21 = vpop.f32.mrb[5].mxu0 }
 0x4aa   :  { %v716_v22 = vpop.f32.mrb[6].mxu1  ;;  %v800_v23 = vpop.f32.mrb[6].mxu0 }
 0x4ab   :  { %v1199_v24 = vpop.f32.mrb[7].mxu1  ;;  %v1204_v25 = vpop.f32.mrb[7].mxu0  ;;  %v882_v26 = vsel %vm553_vm3, %v800_v23, -inf }
 0x4ac   :  { %883 = vmax.xlane.f32.xlu0 %v882_v26 }
 0x4ae   :  { %v878_v27 = vpop.f32.mrb[8].mxu1 }
 0x4af   :  { %v1209_v28 = vpop.f32.mrb[9].mxu1  ;;  %v885_v29 = vsel %vm553_vm3, %v878_v27, -inf }
 0x4b0   :  { %886 = vmax.xlane.f32.xlu1 %v885_v29 }
 0x4c1   :  { %980 = vrot.lane.b32.xlu1 %v397_v62, %s1401_s23 }
 0x4c2   :  { %903 = vrot.lane.b32.xlu0 %v392_v63, %s1401_s23 }
 0x539   :  { %v884_v30 = vpop.xlane.xlu0 %883 }
 0x53a   :  { %v888_v31 = vsub.f32 %v800_v23, %v884_v30 }
 0x53c   :  { %v890_v32 = vmul.f32 1.442695, %v888_v31 }
 0x53d   :  { %v904_v33 = vpop.permute.xlu0 %903  ;;  %v887_v34 = vpop.xlane.xlu1 %886 }
 0x53e   :  { %1263 = vpow2.f32 %v890_v32  ;;  %v889_v35 = vsub.f32 %v878_v27, %v887_v34  ;;  %1211 = vmatpush3.msra.mxu0 %v904_v33 }
 0x540   :  { %v892_v36 = vmul.f32 1.442695, %v889_v35 }
 0x541   :  { %v981_v37 = vpop.permute.xlu1 %980 }
 0x542   :  { %1265 = vpow2.f32 %v892_v36  ;;  %1216 = vmatpush3.msra.mxu1 %v981_v37 }
 0x548   :  { %v1264_v38 = vpop.eup %1263 }
 0x549   :  { %1213 = vmatmul.mubr.msk.f32.vlgmr.msra.gmra.mrb[8].mxu0 %vm553_vm3, %v1264_v38  ;;  %v894_v39 = vsel %vm553_vm3, %v1264_v38, 0.0 }
 0x54a   :  { %895 = vadd.xlane.f32.xlu0 %v894_v39 }
 0x54c   :  { %v1266_v40 = vpop.eup %1265 }
 0x54d   :  { %1218 = vmatmul.mubr.msk.f32.vlgmr.msra.gmra.mrb[10].mxu1 %vm553_vm3, %v1266_v40  ;;  %v897_v42 = vsel %vm553_vm3, %v1266_v40, 0.0 }
 0x54e   :  { %567 = vadd.xlane.f32.xlu0 %v566_v41  ;;  %898 = vadd.xlane.f32.xlu1 %v897_v42 }
 0x552   :  { %570 = vadd.xlane.f32.xlu0 %v569_v43 }
 0x5d7   :  { %v896_v44 = vpop.xlane.xlu0 %895 }
 0x5db   :  { %v568_v45 = vpop.xlane.xlu0 %567  ;;  %v899_v53 = vpop.xlane.xlu1 %898 }
 0x5dc   :  { %1267 = vrcp.f32 %v568_v45 }
 0x5df   :  { %v571_v46 = vpop.xlane.xlu0 %570 }
 0x5e0   :  { %1269 = vrcp.f32 %v571_v46 }
 0x5e1   :  { %1271 = vrcp.f32 %v896_v44 }
 0x5e2   :  { %1273 = vrcp.f32 %v899_v53 }
 0x5e6   :  { %v1268_v47 = vpop.eup %1267 }
 0x5e7   :  { %v720_v48 = vmul.f32 %v1268_v47, %v643_v20 }
 0x5e9   :  { %v722_v49 = vadd.f32 %v720_v48, %v1528_v0 }
 0x5ea   :  { %v1270_v50 = vpop.eup %1269 }
 0x5eb   :  { %v721_v51 = vmul.f32 %v1270_v50, %v716_v22  ;;  %724 = vst.msk [vmem:[#allocation10] sm:$0xff] %vm400_vm2, %v722_v49  ;;  %v1272_v54 = vpop.eup %1271 }
 0x5ec   :  { %v1274_v58 = vpop.eup %1273 }
 0x5ed   :  { %v723_v52 = vadd.f32 %v721_v51, %v1530_v1 }
 0x5ef   :  { %725 = vst.msk [vmem:[#allocation10 + $0x8] sm:$0xff] %vm400_vm2, %v723_v52 }
 0x61c   :  { %v975_v55 = vpop.f32.mrb[8].mxu0 }
 0x61d   :  { %v1056_v56 = vmul.f32 %v1272_v54, %v975_v55  ;;  %v1214_v57 = vpop.f32.mrb[9].mxu0 }
 0x61f   :  { %1060 = vrot.lane.b32.xlu0 %v1056_v56, %s1402_s6 }
 0x620   :  { %v1052_v59 = vpop.f32.mrb[10].mxu1 }
 0x621   :  { %v1057_v60 = vmul.f32 %v1274_v58, %v1052_v59  ;;  %v1219_v61 = vpop.f32.mrb[11].mxu1 }
 0x623   :  { %1062 = vrot.lane.b32.xlu1 %v1057_v60, %s1402_s6 }
 0x691   :  { %v1061_v62 = vpop.permute.xlu0 %1060 }
 0x692   :  { %v1066_v63 = vadd.f32 %v1061_v62, %v1528_v0 }
 0x694   :  { %1069 = vst.msk [vmem:[#allocation10] sm:$0xff] %vm1068_vm4, %v1066_v63 }
 0x695   :  { %v1063_v2 = vpop.permute.xlu1 %1062 }
 0x696   :  { %v1067_v3 = vadd.f32 %v1063_v2, %v1530_v1 }
 0x698   :  { %1070 = vst.msk [vmem:[#allocation10 + $0x8] sm:$0xff] %vm1068_vm4, %v1067_v3 }
 0x699   :  { %1374 = shalt.err (!%p1371_p8)
}
 0x69a   :  { %s1375_s27 = scalar_lea.hbm %s1641_s9, 256 }
 0x69b   :  { %p1376_p9 = scmp.ne.s32.totalorder %s1641_s9, %s1375_s27  ;;  %p1379_p10 = scmp.lt.u32.totalorder %s1375_s27, %s1641_s9 }
 0x69d   :  { %p1381_p11 = pnand %p1379_p10, %p1376_p9 }
 0x69f   :  { %1384 = shalt.err (!%p1381_p11)
}
 0x6a0   :  { %1082 = dma.vmem_to_hbm [thread:$0]  %s1077_s25, 256, %s1641_s9, [#allocation4], %s1395_s21, %s1395_s21, %s1396_s22  }
 0x6a1   :  { %1391 = dma.done.wait [#allocation4], 256  }
 0x6a2   :  { %1392 = vsyncadd [#allocation4], 4294967040 }
 0x6a3   :  { %1086 = vsyncpa [#allocation3], 1 }
 0x6a4   :  { %1087 = vsyncpa [#allocation6], 1 }
 0x6a5   :  { %1088 = vsyncpa [#allocation9], 1 }
 0x6a6   :  { %1089 = vsyncpa [#allocation4], 1 }

</bundles_post_ra>
